<compile_context>
chip_gen: v5e
topology: v5e:2x2
jax: 0.10.0
libtpu: 0.0.40
codegen_flags: <defaults>
</compile_context>

<pallas_src>
from typing import NamedTuple

import jax
import jax.numpy as jnp
from jax import lax
from jax.experimental import pallas as pl
from jax.experimental.pallas import tpu as pltpu

block_size = 8     # T
n_embd = 32        # E
vocab_size = 65    # V (e.g. tiny-shakespeare char vocab)


# ----------------------------------------------------------------------------
# One-time parameter preparation (hoisted out of the per-call forward).
# ----------------------------------------------------------------------------
class PreppedParams(NamedTuple):
    table: jax.Array              # (Vp, Vp)  tok_pad @ W_pad   (f32 or bf16)
    pos_logits: jax.Array         # (Tb, Vp)  pos @ W_pad + b_pad, padded lanes = 0
    pos_logits_masked: jax.Array  # same, padded lanes = -1e30 (loss paths)
    vocab: int                    # V
    vocab_padded: int             # Vp (multiple of 128)


def prep_params(params, use_bf16_table=False):
    """Pad vocab to a 128 multiple and fold both matmuls into lookup tables."""
    tok, pos, w, b = params
    V, E = tok.shape
    Vp = ((V + 127) // 128) * 128

    tok_p = jnp.zeros((Vp, E), jnp.float32).at[:V, :].set(tok.astype(jnp.float32))
    w_p = jnp.zeros((E, Vp), jnp.float32).at[:, :V].set(w.astype(jnp.float32))
    b_p = jnp.zeros((1, Vp), jnp.float32).at[:, :V].set(
        b.astype(jnp.float32).reshape(1, V))

    table = jnp.dot(tok_p, w_p, precision=lax.Precision.HIGHEST)        # (Vp, Vp)
    pos_logits = jnp.dot(pos.astype(jnp.float32), w_p,
                         precision=lax.Precision.HIGHEST) + b_p         # (Tb, Vp)
    lane = jnp.arange(Vp)[None, :]
    pos_logits_masked = jnp.where(lane < V, pos_logits, jnp.float32(-1e30))

    if use_bf16_table:
        # One-hot LHS is exact in bf16; only the table rounds (~1e-3 relative).
        table = table.astype(jnp.bfloat16)
    return PreppedParams(table, pos_logits, pos_logits_masked, V, Vp)


# ----------------------------------------------------------------------------
# Shared in-kernel tile math.
# ----------------------------------------------------------------------------
def _tile_logits(idx_ref, table_ref, pos_ref):
    """Logits for one (bb*T, Vp) tile: onehot @ logits_table + broadcast(pos)."""
    N = idx_ref.shape[0]           # bb*T (static)
    T, Vp = pos_ref.shape
    bb = N // T

    ids = idx_ref[...]                                         # (N, 1) int32
    lane = lax.broadcasted_iota(jnp.int32, (N, Vp), 1)
    onehot = (ids == lane).astype(table_ref.dtype)             # exact in bf16
    precision = (lax.Precision.HIGHEST if table_ref.dtype == jnp.float32
                 else lax.Precision.DEFAULT)
    logits = jnp.dot(onehot, table_ref[...], precision=precision,
                     preferred_element_type=jnp.float32)       # single MXU matmul
    pos = jnp.broadcast_to(pos_ref[...][None, :, :], (bb, T, Vp)).reshape(N, Vp)
    return logits + pos, lane


def _per_row_ce(logits, lane, tgt):
    """Per-row cross-entropy (N, 1); padded lanes already hold -1e30."""
    m = jnp.max(logits, axis=-1, keepdims=True)
    lse = jnp.log(jnp.sum(jnp.exp(logits - m), axis=-1, keepdims=True)) + m
    tgt_logit = jnp.sum(jnp.where(tgt == lane, logits, 0.0),
                        axis=-1, keepdims=True)
    return lse - tgt_logit


# ----------------------------------------------------------------------------
# Kernels.
# ----------------------------------------------------------------------------
def bigram_logits_kernel(idx_ref, table_ref, pos_ref, logits_ref):
    logits, _ = _tile_logits(idx_ref, table_ref, pos_ref)
    logits_ref[...] = logits


def bigram_fused_kernel(idx_ref, tgt_ref, table_ref, pos_ref, logits_ref, ce_ref):
    logits, lane = _tile_logits(idx_ref, table_ref, pos_ref)
    logits_ref[...] = logits
    ce_ref[...] = _per_row_ce(logits, lane, tgt_ref[...])


def bigram_loss_kernel(idx_ref, tgt_ref, table_ref, pos_ref, ce_ref):
    # Loss-only fast path: no (B*T, Vp) logits store at all.
    logits, lane = _tile_logits(idx_ref, table_ref, pos_ref)
    ce_ref[...] = _per_row_ce(logits, lane, tgt_ref[...])


# ----------------------------------------------------------------------------
# Wrapper.
# ----------------------------------------------------------------------------
def _pick_batch_tile(B, T, cap_rows=2048):
    """Largest bb dividing B with bb*T <= cap_rows rows.

    2048 rows x 128 lanes x 4 B = 1 MiB per logits tile: large enough to
    amortize per-grid-step overhead, small enough to double-buffer comfortably
    under v7x's 64 MiB VMEM (v5e/v6e have 128 MiB).  At tiny shapes this
    collapses to a single grid step (multi-step would be pure overhead).
    """
    if B * T <= cap_rows:
        return B
    best = 1
    for bb in range(1, B + 1):
        if B % bb == 0 and bb * T <= cap_rows and (bb * T) % 8 == 0:
            best = bb
    return best


def bigram_forward(idx, prepped, targets=None, *, return_logits=True):
    """Mirrors BiagramLanguageModel.forward.

    targets=None                         -> (logits (B, T, V), None)
    targets given                        -> (logits (B*T, V), loss)  [PyTorch flat view]
    targets given, return_logits=False   -> (None, loss)             [loss-only fast path]
    """
    V, Vp = prepped.vocab, prepped.vocab_padded
    B, T = idx.shape
    N = B * T
    bb = _pick_batch_tile(B, T)
    bbN = bb * T
    grid = (B // bb,)

    idx_flat = idx.astype(jnp.int32).reshape(N, 1)
    pos_clean = prepped.pos_logits[:T]
    pos_masked = prepped.pos_logits_masked[:T]

    idx_spec = pl.BlockSpec((bbN, 1), lambda i: (i, 0))
    table_spec = pl.BlockSpec((Vp, Vp), lambda i: (0, 0))
    pos_spec = pl.BlockSpec((T, Vp), lambda i: (0, 0))
    logits_spec = pl.BlockSpec((bbN, Vp), lambda i: (i, 0))
    ce_spec = pl.BlockSpec((bbN, 1), lambda i: (i, 0))
    cparams = pltpu.CompilerParams(dimension_semantics=("parallel",))

    if targets is None:
        logits_flat = pl.pallas_call(
            bigram_logits_kernel,
            grid=grid,
            out_shape=jax.ShapeDtypeStruct((N, Vp), jnp.float32),
            in_specs=[idx_spec, table_spec, pos_spec],
            out_specs=logits_spec,
            compiler_params=cparams,
        )(idx_flat, prepped.table, pos_clean)
        # NOTE: this slice is a wrapper-side copy kept only for PyTorch-shape
        # fidelity; consumers that tolerate the 128-padded vocab can use
        # logits_flat directly and avoid the extra HBM pass.
        return logits_flat[:, :V].reshape(B, T, V), None

    tgt_flat = targets.astype(jnp.int32).reshape(N, 1)

    if not return_logits:
        ce_rows = pl.pallas_call(
            bigram_loss_kernel,
            grid=grid,
            out_shape=jax.ShapeDtypeStruct((N, 1), jnp.float32),
            in_specs=[idx_spec, idx_spec, table_spec, pos_spec],
            out_specs=ce_spec,
            compiler_params=cparams,
        )(idx_flat, tgt_flat, prepped.table, pos_masked)
        return None, jnp.mean(ce_rows)

    logits_flat, ce_rows = pl.pallas_call(
        bigram_fused_kernel,
        grid=grid,
        out_shape=(jax.ShapeDtypeStruct((N, Vp), jnp.float32),
                   jax.ShapeDtypeStruct((N, 1), jnp.float32)),
        in_specs=[idx_spec, idx_spec, table_spec, pos_spec],
        out_specs=(logits_spec, ce_spec),
        compiler_params=cparams,
    )(idx_flat, tgt_flat, prepped.table, pos_masked)
    # Padded lanes of logits_flat hold -1e30 (masked bias); sliced away here.
    return logits_flat[:, :V], jnp.mean(ce_rows)


# ----------------------------------------------------------------------------
# Pure-JAX reference (for correctness checks).
# ----------------------------------------------------------------------------
def bigram_forward_ref(idx, params, targets=None):
    tok, pos, w, b = params
    B, T = idx.shape
    x = tok[idx] + pos[:T][None, :, :]
    logits = jnp.dot(x, w, precision=lax.Precision.HIGHEST) + b   # (B, T, V)
    if targets is None:
        return logits, None
    V = logits.shape[-1]
    lf = logits.reshape(B * T, V)
    tf = targets.reshape(B * T)
    lse = jax.nn.logsumexp(lf, axis=-1)
    loss = jnp.mean(lse - lf[jnp.arange(B * T), tf])
    return lf, loss


def init_params(key):
    k_tok, k_pos, k_w, k_b = jax.random.split(key, 4)
    # nn.Embedding default init: N(0, 1)
    tok_table = jax.random.normal(k_tok, (vocab_size, n_embd), jnp.float32)
    pos_table = jax.random.normal(k_pos, (block_size, n_embd), jnp.float32)
    # nn.Linear default init: U(-1/sqrt(fan_in), 1/sqrt(fan_in)); stored as (E, V)
    bound = 1.0 / jnp.sqrt(jnp.float32(n_embd))
    w = jax.random.uniform(k_w, (n_embd, vocab_size), jnp.float32, -bound, bound)
    b = jax.random.uniform(k_b, (1, vocab_size), jnp.float32, -bound, bound)
    return tok_table, pos_table, w, b


# TODO(synk): generate() (autoregressive sampling with torch.multinomial) is a
# host-side loop around this forward; not implemented as a kernel.

if __name__ == "__main__":
    key = jax.random.PRNGKey(0)
    k_params, k_idx, k_tgt = jax.random.split(key, 3)

    params = init_params(k_params)
    prepped = prep_params(params)          # hoisted: done once, not per forward

    B, T = 2, block_size
    idx = jax.random.randint(k_idx, (B, T), 0, vocab_size, dtype=jnp.int32)
    targets = jax.random.randint(k_tgt, (B, T), 0, vocab_size, dtype=jnp.int32)

    # Fused logits + loss path
    logits, loss = bigram_forward(idx, prepped, targets)
    logits, loss = jax.block_until_ready((logits, loss))
    assert logits.shape == (B * T, vocab_size)
    assert loss.shape == ()

    # Loss-only fast path (no logits HBM store)
    _, loss_only = bigram_forward(idx, prepped, targets, return_logits=False)
    loss_only = jax.block_until_ready(loss_only)
    assert loss_only.shape == ()

    # targets=None path (loss is None, logits kept (B, T, V))
    logits_only, loss_none = bigram_forward(idx, prepped, None)
    logits_only = jax.block_until_ready(logits_only)
    assert logits_only.shape == (B, T, vocab_size)
    assert loss_none is None

    # Correctness vs pure-JAX reference
    ref_logits, ref_loss = bigram_forward_ref(idx, params, targets)
    assert jnp.allclose(logits, ref_logits, atol=1e-3, rtol=1e-3)
    assert jnp.allclose(loss, ref_loss, atol=1e-3, rtol=1e-3)
    assert jnp.allclose(loss_only, ref_loss, atol=1e-3, rtol=1e-3)
    ref_logits3, _ = bigram_forward_ref(idx, params, None)
    assert jnp.allclose(logits_only, ref_logits3, atol=1e-3, rtol=1e-3)

    # bf16 logits table (v5e bf16-native MXU); one-hot exact, table ~1e-3 rel.
    prepped_bf16 = prep_params(params, use_bf16_table=True)
    _, loss_bf16 = bigram_forward(idx, prepped_bf16, targets, return_logits=False)
    loss_bf16 = jax.block_until_ready(loss_bf16)
    assert jnp.allclose(loss_bf16, ref_loss, atol=5e-2, rtol=5e-2)

    print("KERNEL_OK")
</pallas_src>

<mosaic_0001>
module attributes {stable_mosaic.version = 11 : i64} {
  func.func @bigram_fused_kernel(%arg0: i32, %arg1: memref<16x1xi32, #tpu.memory_space<vmem>>, %arg2: memref<16x1xi32, #tpu.memory_space<vmem>>, %arg3: memref<128x128xf32, #tpu.memory_space<vmem>>, %arg4: memref<8x128xf32, #tpu.memory_space<vmem>>, %arg5: memref<16x128xf32, #tpu.memory_space<vmem>>, %arg6: memref<16x1xf32, #tpu.memory_space<vmem>>) attributes {dimension_semantics = [#tpu.dimension_semantics<parallel>], iteration_bounds = array<i64: 1>, scalar_prefetch = 0 : i64, scratch_operands = 0 : i64, tpu.core_type = #tpu.core_type<tc>, window_params = [{transform_indices = @transform_0, window_bounds = array<i64: 16, 1>}, {transform_indices = @transform_1, window_bounds = array<i64: 16, 1>}, {pipeline_mode = #tpu.pipeline_mode<synchronous>, transform_indices = @transform_2, window_bounds = array<i64: 128, 128>}, {pipeline_mode = #tpu.pipeline_mode<synchronous>, transform_indices = @transform_3, window_bounds = array<i64: 8, 128>}, {transform_indices = @transform_4, window_bounds = array<i64: 16, 128>}, {transform_indices = @transform_5, window_bounds = array<i64: 16, 1>}]} {
    %c0 = arith.constant 0 : index
    %c0_0 = arith.constant 0 : index
    %0 = vector.load %arg1[%c0, %c0_0] : memref<16x1xi32, #tpu.memory_space<vmem>>, vector<16x1xi32>
    %1 = tpu.iota {dimensions = array<i32: 1>} : vector<16x128xi32>
    %2 = vector.broadcast %0 : vector<16x1xi32> to vector<16x128xi32>
    %3 = arith.cmpi eq, %2, %1 : vector<16x128xi32>
    %4 = arith.extui %3 : vector<16x128xi1> to vector<16x128xi32>
    %5 = arith.sitofp %4 : vector<16x128xi32> to vector<16x128xf32>
    %c0_1 = arith.constant 0 : index
    %c0_2 = arith.constant 0 : index
    %6 = vector.load %arg3[%c0_1, %c0_2] : memref<128x128xf32, #tpu.memory_space<vmem>>, vector<128x128xf32>
    %cst = arith.constant dense<0.000000e+00> : vector<16x128xf32>
    %7 = tpu.matmul %5, %6, %cst {dimension_numbers = #tpu.dot_dimension_numbers<[1], [0], [0], [1], [0, 0, 1, 1], [], []>, precision = #tpu.contract_precision<fp32>} : vector<16x128xf32>, vector<128x128xf32>, vector<16x128xf32> -> vector<16x128xf32>
    %c0_3 = arith.constant 0 : index
    %c0_4 = arith.constant 0 : index
    %8 = vector.load %arg4[%c0_3, %c0_4] : memref<8x128xf32, #tpu.memory_space<vmem>>, vector<8x128xf32>
    %9 = vector.shape_cast %8 : vector<8x128xf32> to vector<1x8x128xf32>
    %10 = vector.shape_cast %9 : vector<1x8x128xf32> to vector<1x8x128xf32>
    %11 = vector.broadcast %10 : vector<1x8x128xf32> to vector<2x8x128xf32>
    %12 = vector.shape_cast %11 : vector<2x8x128xf32> to vector<16x128xf32>
    %13 = arith.addf %7, %12 : vector<16x128xf32>
    %c0_5 = arith.constant 0 : index
    %c0_6 = arith.constant 0 : index
    %14 = vector.load %arg5[%c0_5, %c0_6] : memref<16x128xf32, #tpu.memory_space<vmem>>, vector<16x128xf32>
    tpu.vector_store %arg5[%c0_5, %c0_6], %13 {strides = array<i32>} : memref<16x128xf32, #tpu.memory_space<vmem>>, vector<16x128xf32>,
    %c0_7 = arith.constant 0 : index
    %c0_8 = arith.constant 0 : index
    %15 = vector.load %arg2[%c0_7, %c0_8] : memref<16x1xi32, #tpu.memory_space<vmem>>, vector<16x1xi32>
    %cst_9 = arith.constant dense<0xFF800000> : vector<16xf32>
    %16 = vector.multi_reduction <maximumf>, %13, %cst_9 [1] : vector<16x128xf32> to vector<16xf32>
    %17 = vector.shape_cast %16 : vector<16xf32> to vector<16x1xf32>
    %18 = vector.broadcast %17 : vector<16x1xf32> to vector<16x128xf32>
    %19 = arith.subf %13, %18 : vector<16x128xf32>
    %20 = math.exp %19 : vector<16x128xf32>
    %cst_10 = arith.constant dense<0.000000e+00> : vector<16xf32>
    %21 = vector.multi_reduction <add>, %20, %cst_10 [1] : vector<16x128xf32> to vector<16xf32>
    %22 = vector.shape_cast %21 : vector<16xf32> to vector<16x1xf32>
    %23 = math.log %22 : vector<16x1xf32>
    %24 = arith.addf %23, %17 : vector<16x1xf32>
    %25 = vector.broadcast %15 : vector<16x1xi32> to vector<16x128xi32>
    %26 = arith.cmpi eq, %25, %1 : vector<16x128xi32>
    %cst_11 = arith.constant 0.000000e+00 : f32
    %27 = vector.broadcast %cst_11 : f32 to vector<16x128xf32>
    %28 = arith.select %26, %13, %27 : vector<16x128xi1>, vector<16x128xf32>
    %cst_12 = arith.constant dense<0.000000e+00> : vector<16xf32>
    %29 = vector.multi_reduction <add>, %28, %cst_12 [1] : vector<16x128xf32> to vector<16xf32>
    %30 = vector.shape_cast %29 : vector<16xf32> to vector<16x1xf32>
    %31 = arith.subf %24, %30 : vector<16x1xf32>
    %c0_13 = arith.constant 0 : index
    %c0_14 = arith.constant 0 : index
    %32 = vector.load %arg6[%c0_13, %c0_14] : memref<16x1xf32, #tpu.memory_space<vmem>>, vector<16x1xf32>
    tpu.vector_store %arg6[%c0_13, %c0_14], %31 {strides = array<i32>} : memref<16x1xf32, #tpu.memory_space<vmem>>, vector<16x1xf32>,
    return
  }
  func.func @transform_0(%arg0: i32) -> (i32, i32) {
    %c0_i32 = arith.constant 0 : i32
    %c0_i32_0 = arith.constant 0 : i32
    return %arg0, %c0_i32 : i32, i32
  }
  func.func @transform_1(%arg0: i32) -> (i32, i32) {
    %c0_i32 = arith.constant 0 : i32
    %c0_i32_0 = arith.constant 0 : i32
    return %arg0, %c0_i32 : i32, i32
  }
  func.func @transform_2(%arg0: i32) -> (i32, i32) {
    %c0_i32 = arith.constant 0 : i32
    %c0_i32_0 = arith.constant 0 : i32
    %c0_i32_1 = arith.constant 0 : i32
    return %c0_i32, %c0_i32_0 : i32, i32
  }
  func.func @transform_3(%arg0: i32) -> (i32, i32) {
    %c0_i32 = arith.constant 0 : i32
    %c0_i32_0 = arith.constant 0 : i32
    %c0_i32_1 = arith.constant 0 : i32
    return %c0_i32, %c0_i32_0 : i32, i32
  }
  func.func @transform_4(%arg0: i32) -> (i32, i32) {
    %c0_i32 = arith.constant 0 : i32
    %c0_i32_0 = arith.constant 0 : i32
    return %arg0, %c0_i32 : i32, i32
  }
  func.func @transform_5(%arg0: i32) -> (i32, i32) {
    %c0_i32 = arith.constant 0 : i32
    %c0_i32_0 = arith.constant 0 : i32
    return %arg0, %c0_i32 : i32, i32
  }
}

</mosaic_0001>

<bundles_post_ra>
// kernel: tpu_custom_call.1
= control target key start
LH: loop header
LB: loop body
LE: loop exit
PB: predicated region body
PF: predicated region fallthrough
CT: control target
= control target key end

     0   :  { %11 = vsyncpa [#allocation3], 0  ;;  %s892_s0 = inlined_call_operand.vmem [shape: s32[16,1], index: 0, kind: input, shape index: {}]   ;;  %s893_s1 = inlined_call_operand.vmem [shape: s32[16,1], index: 1, kind: input, shape index: {}]   ;;  %s894_s2 = inlined_call_operand.hbm [shape: f32[128,128], index: 2, kind: input, shape index: {}]   ;;  %s895_s3 = inlined_call_operand.vmem [shape: f32[8,128], index: 3, kind: input, shape index: {}]   ;;  %s896_s4 = inlined_call_operand.hbm [shape: f32[16,128], index: 4, kind: output, shape index: {0}]   ;;  %s897_s5 = inlined_call_operand.vmem [shape: f32[16,1], index: 5, kind: output, shape index: {1}]  }
   0x1   :  { %12 = vsyncpa [#allocation4], 0  ;;  %s21_s20 = sshll.u32 %s894_s2, 4  ;;  %s616_s21 = smov [#allocation2]   ;;  %s22_s20 = int_to_ptr.hbm [resolvable:$true] %s21_s20 }
   0x2   :  { %s23_s22 = sshll.u32 %s616_s21, 4  ;;  %s617_s23 = smov 128   ;;  %s24_s22 = int_to_ptr.vmem [resolvable:$true] %s23_s22 }
   0x3   :  { %s618_s24 = smov 8  }
   0x4   :  { %29 = dma.hbm_to_vmem [thread:$0]  %s22_s20, 2048, %s24_s22, [#allocation3], %s617_s23, %s617_s23, %s618_s24  }
   0x5   :  { %612 = dma.done.wait [#allocation3], 2048  }
   0x6   :  { %613 = vsyncadd [#allocation3], 4294965248  ;;  %v619_v0 = vmov 0   ;;  %v36_v1 = vld [vmem:[%s892_s0] sm:$0xff]  ;;  %v67_v2 = vld [vmem:[#allocation2 + $0x78] sm:$0xff]  ;;  %s490_s10 = sshll.u32 %s896_s4, 4  ;;  %s491_s10 = int_to_ptr.hbm [resolvable:$true] %s490_s10 }
   0x7   :  { %554 = vset.pattern.permute.xlu0 %v619_v0  ;;  %555 = vset.pattern.permute.xlu2 %v619_v0  ;;  %v662_v3 = vand.u32 4294901760, %v67_v2  ;;  %v66_v4 = vld [vmem:[#allocation2 + $0x70] sm:$0xff]  ;;  %v65_v5 = vld [vmem:[#allocation2 + $0x68] sm:$0xff]  ;;  %v64_v6 = vld [vmem:[#allocation2 + $0x60] sm:$0xff]  ;;  %vm481_vm4 = vcmask 7168  }
   0x8   :  { %41 = vperm.xlu0 %554, %v36_v1   ;;  %v664_v7 = vand.u32 4294901760, %v66_v4  ;;  %v666_v8 = vand.u32 4294901760, %v65_v5  ;;  %v668_v9 = vand.u32 4294901760, %v64_v6  ;;  %v63_v10 = vld [vmem:[#allocation2 + $0x58] sm:$0xff]  ;;  %v62_v11 = vld [vmem:[#allocation2 + $0x50] sm:$0xff]  ;;  %v61_v12 = vld [vmem:[#allocation2 + $0x48] sm:$0xff] }
   0x9   :  { %v119_v13 = vsub.f32 %v67_v2, %v662_v3  ;;  %283 = vmatpush.msra.mxu3 %v662_v3  ;;  %v672_v14 = vand.u32 4294901760, %v63_v10  ;;  %70 = vmatpush.msra.mxu0 %v662_v3  ;;  %v675_v15 = vand.u32 4294901760, %v62_v11  ;;  %v677_v16 = vand.u32 4294901760, %v61_v12  ;;  %v60_v17 = vld [vmem:[#allocation2 + $0x40] sm:$0xff]  ;;  %v37_v25 = vld [vmem:[%s892_s0 + $0x8] sm:$0xff]  ;;  %v59_v35 = vld [vmem:[#allocation2 + $0x38] sm:$0xff] }
   0xa   :  { %v125_v18 = vsub.f32 %v66_v4, %v664_v7  ;;  %v131_v19 = vsub.f32 %v65_v5, %v666_v8  ;;  %v137_v20 = vsub.f32 %v64_v6, %v668_v9  ;;  %v682_v21 = vand.u32 4294901760, %v60_v17  ;;  %v58_v39 = vld [vmem:[#allocation2 + $0x30] sm:$0xff]  ;;  %v57_v40 = vld [vmem:[#allocation2 + $0x28] sm:$0xff]  ;;  %v56_v43 = vld [vmem:[#allocation2 + $0x20] sm:$0xff] }
   0xb   :  { %v684_v22 = vand.u32 4294901760, %v119_v13  ;;  %225 = vmatpush.msra.mxu2 %v119_v13  ;;  %285 = vmatpush.msra.mxu3 %v664_v7  ;;  %v143_v23 = vsub.f32 %v63_v10, %v672_v14  ;;  %v149_v24 = vsub.f32 %v62_v11, %v675_v15  ;;  %v155_v29 = vsub.f32 %v61_v12, %v677_v16  ;;  %v55_v50 = vld [vmem:[#allocation2 + $0x18] sm:$0xff]  ;;  %v54_v57 = vld [vmem:[#allocation2 + $0x10] sm:$0xff]  ;;  %v53_v63 = vld [vmem:[#allocation2 + $0x8] sm:$0xff] }
   0xc   :  { %v692_v26 = vand.u32 4294901760, %v125_v18  ;;  %v694_v27 = vand.u32 4294901760, %v131_v19  ;;  %v696_v28 = vand.u32 4294901760, %v137_v20  ;;  %72 = vmatpush.msra.mxu0 %v664_v7  ;;  %v161_v34 = vsub.f32 %v60_v17, %v682_v21  ;;  %v52_v6 = vld [vmem:[#allocation2] sm:$0xff] }
   0xd   :  { %v121_v30 = vsub.f32 %v119_v13, %v684_v22  ;;  %228 = vmatpush.msra.mxu2 %v125_v18  ;;  %v701_v31 = vand.u32 4294901760, %v143_v23  ;;  %287 = vmatpush.msra.mxu3 %v666_v8  ;;  %v709_v38 = vand.u32 4294901760, %v149_v24  ;;  %v712_v42 = vand.u32 4294901760, %v155_v29 }
   0xe   :  { %v127_v32 = vsub.f32 %v125_v18, %v692_v26  ;;  %v133_v33 = vsub.f32 %v131_v19, %v694_v27  ;;  %74 = vmatpush.msra.mxu0 %v666_v8  ;;  %v139_v37 = vsub.f32 %v137_v20, %v696_v28  ;;  %v716_v46 = vand.u32 4294901760, %v59_v35 }
   0xf   :  { %v122_v36 = vand.u32 4294901760, %v121_v30  ;;  %231 = vmatpush.msra.mxu2 %v131_v19  ;;  %289 = vmatpush.msra.mxu3 %v668_v9  ;;  %v145_v45 = vsub.f32 %v143_v23, %v701_v31  ;;  %v719_v47 = vand.u32 4294901760, %v161_v34  ;;  %v722_v48 = vand.u32 4294901760, %v58_v39 }
  0x10   :  { %44 = vperm.xlu0 %554, %v37_v25   ;;  %v128_v41 = vand.u32 4294901760, %v127_v32  ;;  %76 = vmatpush.msra.mxu0 %v668_v9  ;;  %v134_v44 = vand.u32 4294901760, %v133_v33  ;;  %v724_v49 = vand.u32 4294901760, %v57_v40  ;;  %v140_v51 = vand.u32 4294901760, %v139_v37 }
  0x11   :  { %123 = vmatpush.msra.mxu1 %v122_v36  ;;  %234 = vmatpush.msra.mxu2 %v137_v20  ;;  %v151_v52 = vsub.f32 %v149_v24, %v709_v38  ;;  %v167_v53 = vsub.f32 %v59_v35, %v716_v46  ;;  %v728_v54 = vand.u32 4294901760, %v56_v43  ;;  %v157_v55 = vsub.f32 %v155_v29, %v712_v42 }
  0x12   :  { %291 = vmatpush.msra.mxu3 %v672_v14  ;;  %78 = vmatpush.msra.mxu0 %v672_v14  ;;  %v173_v56 = vsub.f32 %v58_v39, %v722_v48  ;;  %v146_v58 = vand.u32 4294901760, %v145_v45  ;;  %v179_v60 = vsub.f32 %v57_v40, %v724_v49  ;;  %v737_v61 = vand.u32 4294901760, %v55_v50 }
  0x13   :  { %129 = vmatpush.msra.mxu1 %v128_v41  ;;  %237 = vmatpush.msra.mxu2 %v143_v23  ;;  %v734_v59 = vand.u32 4294901760, %v167_v53  ;;  %v163_v62 = vsub.f32 %v161_v34, %v719_v47  ;;  %v152_v0 = vand.u32 4294901760, %v151_v52  ;;  %v185_v2 = vsub.f32 %v56_v43, %v728_v54 }
  0x14   :  { %293 = vmatpush.msra.mxu3 %v675_v15  ;;  %80 = vmatpush.msra.mxu0 %v675_v15  ;;  %v742_v1 = vand.u32 4294901760, %v173_v56  ;;  %v745_v4 = vand.u32 4294901760, %v54_v57  ;;  %v158_v5 = vand.u32 4294901760, %v157_v55  ;;  %v750_v11 = vand.u32 4294901760, %v179_v60 }
  0x15   :  { %135 = vmatpush.msra.mxu1 %v134_v44  ;;  %240 = vmatpush.msra.mxu2 %v149_v24  ;;  %v169_v10 = vsub.f32 %v167_v53, %v734_v59  ;;  %v191_v12 = vsub.f32 %v55_v50, %v737_v61  ;;  %v753_v13 = vand.u32 4294901760, %v53_v63  ;;  %v164_v17 = vand.u32 4294901760, %v163_v62 }
  0x16   :  { %295 = vmatpush.msra.mxu3 %v677_v16  ;;  %82 = vmatpush.msra.mxu0 %v677_v16  ;;  %v175_v18 = vsub.f32 %v173_v56, %v742_v1  ;;  %v758_v19 = vand.u32 4294901760, %v185_v2  ;;  %v197_v20 = vsub.f32 %v54_v57, %v745_v4  ;;  %v761_v23 = vand.u32 4294901760, %v52_v6 }
  0x17   :  { %141 = vmatpush.msra.mxu1 %v140_v51  ;;  %243 = vmatpush.msra.mxu2 %v155_v29  ;;  %v170_v24 = vand.u32 4294901760, %v169_v10  ;;  %v181_v25 = vsub.f32 %v179_v60, %v750_v11  ;;  %v766_v29 = vand.u32 4294901760, %v191_v12  ;;  %v203_v30 = vsub.f32 %v53_v63, %v753_v13 }
  0x18   :  { %297 = vmatpush.msra.mxu3 %v682_v21  ;;  %84 = vmatpush.msra.mxu0 %v682_v21  ;;  %v176_v32 = vand.u32 4294901760, %v175_v18  ;;  %v187_v33 = vsub.f32 %v185_v2, %v758_v19  ;;  %v209_v35 = vsub.f32 %v52_v6, %v761_v23 }
  0x19   :  { %147 = vmatpush.msra.mxu1 %v146_v58  ;;  %246 = vmatpush.msra.mxu2 %v161_v34  ;;  %v772_v34 = vand.u32 4294901760, %v197_v20  ;;  %v182_v36 = vand.u32 4294901760, %v181_v25  ;;  %v193_v37 = vsub.f32 %v191_v12, %v766_v29  ;;  %v778_v39 = vand.u32 4294901760, %v203_v30 }
  0x1a   :  { %299 = vmatpush.msra.mxu3 %v716_v46  ;;  %86 = vmatpush.msra.mxu0 %v716_v46  ;;  %v188_v40 = vand.u32 4294901760, %v187_v33  ;;  %v783_v43 = vand.u32 4294901760, %v209_v35 }
  0x1b   :  { %153 = vmatpush.msra.mxu1 %v152_v0  ;;  %249 = vmatpush.msra.mxu2 %v167_v53  ;;  %v199_v41 = vsub.f32 %v197_v20, %v772_v34  ;;  %v194_v44 = vand.u32 4294901760, %v193_v37  ;;  %v205_v45 = vsub.f32 %v203_v30, %v778_v39 }
  0x1c   :  { %301 = vmatpush.msra.mxu3 %v722_v48  ;;  %88 = vmatpush.msra.mxu0 %v722_v48  ;;  %v211_v51 = vsub.f32 %v209_v35, %v783_v43 }
  0x1d   :  { %159 = vmatpush.msra.mxu1 %v158_v5  ;;  %252 = vmatpush.msra.mxu2 %v173_v56  ;;  %v200_v50 = vand.u32 4294901760, %v199_v41  ;;  %v206_v52 = vand.u32 4294901760, %v205_v45 }
  0x1e   :  { %303 = vmatpush.msra.mxu3 %v724_v49  ;;  %90 = vmatpush.msra.mxu0 %v724_v49  ;;  %v212_v53 = vand.u32 4294901760, %v211_v51 }
  0x1f   :  { %165 = vmatpush.msra.mxu1 %v164_v17  ;;  %255 = vmatpush.msra.mxu2 %v179_v60 }
  0x20   :  { %305 = vmatpush.msra.mxu3 %v728_v54  ;;  %92 = vmatpush.msra.mxu0 %v728_v54 }
  0x21   :  { %171 = vmatpush.msra.mxu1 %v170_v24  ;;  %258 = vmatpush.msra.mxu2 %v185_v2 }
  0x22   :  { %307 = vmatpush.msra.mxu3 %v737_v61  ;;  %94 = vmatpush.msra.mxu0 %v737_v61 }
  0x23   :  { %177 = vmatpush.msra.mxu1 %v176_v32  ;;  %261 = vmatpush.msra.mxu2 %v191_v12 }
  0x24   :  { %309 = vmatpush.msra.mxu3 %v745_v4  ;;  %96 = vmatpush.msra.mxu0 %v745_v4 }
  0x25   :  { %183 = vmatpush.msra.mxu1 %v182_v36  ;;  %264 = vmatpush.msra.mxu2 %v197_v20 }
  0x26   :  { %311 = vmatpush.msra.mxu3 %v753_v13  ;;  %98 = vmatpush.msra.mxu0 %v753_v13 }
  0x27   :  { %189 = vmatpush.msra.mxu1 %v188_v40  ;;  %267 = vmatpush.msra.mxu2 %v203_v30 }
  0x28   :  { %313 = vmatpush.msra.mxu3 %v761_v23  ;;  %100 = vmatpush.msra.mxu0 %v761_v23 }
  0x29   :  { %195 = vmatpush.msra.mxu1 %v194_v44  ;;  %270 = vmatpush.msra.mxu2 %v209_v35 }
  0x2a   :  { %531 = vmatpush.msrb.mxu3 %v662_v3  ;;  %330 = vmatpush.msrb.mxu0 %v684_v22 }
  0x2b   :  { %515 = vmatpush.msrb.mxu2 %v684_v22  ;;  %201 = vmatpush.msra.mxu1 %v200_v50 }
  0x2c   :  { %532 = vmatpush.msrb.mxu3 %v664_v7  ;;  %334 = vmatpush.msrb.mxu0 %v692_v26 }
  0x2d   :  { %516 = vmatpush.msrb.mxu2 %v692_v26  ;;  %207 = vmatpush.msra.mxu1 %v206_v52 }
  0x2e   :  { %533 = vmatpush.msrb.mxu3 %v666_v8  ;;  %338 = vmatpush.msrb.mxu0 %v694_v27 }
  0x2f   :  { %517 = vmatpush.msrb.mxu2 %v694_v27  ;;  %213 = vmatpush.msra.mxu1 %v212_v53 }
  0x30   :  { %534 = vmatpush.msrb.mxu3 %v668_v9  ;;  %342 = vmatpush.msrb.mxu0 %v696_v28 }
  0x31   :  { %401 = vmatpush.msrb.mxu1 %v662_v3  ;;  %518 = vmatpush.msrb.mxu2 %v696_v28  ;;  %v38_v3 = vlaneseq }
  0x32   :  { %535 = vmatpush.msrb.mxu3 %v672_v14  ;;  %346 = vmatpush.msrb.mxu0 %v701_v31 }
  0x33   :  { %403 = vmatpush.msrb.mxu1 %v664_v7  ;;  %519 = vmatpush.msrb.mxu2 %v701_v31  ;;  %v443_v7 = vld [vmem:[%s893_s1] sm:$0xff] }
  0x34   :  { %536 = vmatpush.msrb.mxu3 %v675_v15  ;;  %350 = vmatpush.msrb.mxu0 %v709_v38 }
  0x35   :  { %405 = vmatpush.msrb.mxu1 %v666_v8  ;;  %520 = vmatpush.msrb.mxu2 %v709_v38  ;;  %v860_v8 = vand.u32 127, %v38_v3 }
  0x36   :  { %537 = vmatpush.msrb.mxu3 %v677_v16  ;;  %354 = vmatpush.msrb.mxu0 %v712_v42 }
  0x37   :  { %407 = vmatpush.msrb.mxu1 %v668_v9  ;;  %521 = vmatpush.msrb.mxu2 %v712_v42 }
  0x38   :  { %538 = vmatpush.msrb.mxu3 %v682_v21  ;;  %358 = vmatpush.msrb.mxu0 %v719_v47 }
  0x39   :  { %409 = vmatpush.msrb.mxu1 %v672_v14  ;;  %522 = vmatpush.msrb.mxu2 %v719_v47  ;;  %v444_v14 = vld [vmem:[%s893_s1 + $0x8] sm:$0xff] }
  0x3a   :  { %539 = vmatpush.msrb.mxu3 %v716_v46  ;;  %362 = vmatpush.msrb.mxu0 %v734_v59 }
  0x3b   :  { %411 = vmatpush.msrb.mxu1 %v675_v15  ;;  %523 = vmatpush.msrb.mxu2 %v734_v59  ;;  %v620_v15 = vmov 1.0  }
  0x3c   :  { %540 = vmatpush.msrb.mxu3 %v722_v48  ;;  %366 = vmatpush.msrb.mxu0 %v742_v1 }
  0x3d   :  { %413 = vmatpush.msrb.mxu1 %v677_v16  ;;  %524 = vmatpush.msrb.mxu2 %v742_v1  ;;  %v621_v16 = vmov 0.0  }
  0x3e   :  { %541 = vmatpush.msrb.mxu3 %v724_v49  ;;  %370 = vmatpush.msrb.mxu0 %v750_v11 }
  0x3f   :  { %415 = vmatpush.msrb.mxu1 %v682_v21  ;;  %525 = vmatpush.msrb.mxu2 %v750_v11 }
  0x40   :  { %542 = vmatpush.msrb.mxu3 %v728_v54  ;;  %374 = vmatpush.msrb.mxu0 %v758_v19 }
  0x41   :  { %417 = vmatpush.msrb.mxu1 %v716_v46  ;;  %526 = vmatpush.msrb.mxu2 %v758_v19 }
  0x42   :  { %543 = vmatpush.msrb.mxu3 %v737_v61  ;;  %378 = vmatpush.msrb.mxu0 %v766_v29 }
  0x43   :  { %419 = vmatpush.msrb.mxu1 %v722_v48  ;;  %527 = vmatpush.msrb.mxu2 %v766_v29 }
  0x44   :  { %544 = vmatpush.msrb.mxu3 %v745_v4  ;;  %382 = vmatpush.msrb.mxu0 %v772_v34 }
  0x45   :  { %421 = vmatpush.msrb.mxu1 %v724_v49  ;;  %528 = vmatpush.msrb.mxu2 %v772_v34 }
  0x46   :  { %545 = vmatpush.msrb.mxu3 %v753_v13  ;;  %386 = vmatpush.msrb.mxu0 %v778_v39 }
  0x47   :  { %423 = vmatpush.msrb.mxu1 %v728_v54  ;;  %529 = vmatpush.msrb.mxu2 %v778_v39  ;;  %v68_v54 = vld [vmem:[%s895_s3] sm:$0xff]  ;;  %s622_s3 = smov [#allocation5]  }
  0x48   :  { %546 = vmatpush.msrb.mxu3 %v761_v23  ;;  %390 = vmatpush.msrb.mxu0 %v783_v43  ;;  %s488_s7 = sshll.u32 %s622_s3, 4  ;;  %s489_s7 = int_to_ptr.vmem [resolvable:$true] %s488_s7 }
  0x49   :  { %425 = vmatpush.msrb.mxu1 %v737_v61  ;;  %530 = vmatpush.msrb.mxu2 %v783_v43 }
  0x4a   :  { %466 = vperm.xlu2 %555, %v443_v7  }
  0x4b   :  { %427 = vmatpush.msrb.mxu1 %v745_v4 }
  0x4d   :  { %429 = vmatpush.msrb.mxu1 %v753_v13 }
  0x4f   :  { %431 = vmatpush.msrb.mxu1 %v761_v23 }
  0x52   :  { %469 = vperm.xlu2 %555, %v444_v14  }
  0x7a   :  { %v42_v9 = vpop.permute.xlu0 %41 }
  0x7b   :  { %vm46_vm0 = vcmp.eq.s32.totalorder %v42_v9, %v860_v8 }
  0x7c   :  { %509 = vmatmul.msk.f32.vlgmr.msra.gmra.mxu1 %vm46_vm0, %v620_v15  ;;  %v507_v21 = vsel %vm46_vm0, 1.0, %v621_v16 }
  0x7d   :  { %v102_v22 = vsub.f32 %v507_v21, %v507_v21 }
  0x7f   :  { %273 = vmatmul.f32.vlgmr.msra.gmra.mxu2 %v102_v22  ;;  %v103_v26 = vand.u32 4294901760, %v102_v22 }
  0x81   :  { %317 = vmatmul.f32.vlgmr.msra.gmra.mxu3 %v103_v26  ;;  %v104_v27 = vsub.f32 %v102_v22, %v103_v26 }
  0x82   :  { %v45_v28 = vpop.permute.xlu0 %44 }
  0x83   :  { %vm47_vm1 = vcmp.eq.s32.totalorder %v45_v28, %v860_v8  ;;  %v105_v31 = vand.u32 4294901760, %v104_v27 }
  0x84   :  { %510 = vmatmul.msk.f32.gmra.mxu1 %vm47_vm1, %v620_v15  ;;  %v508_v38 = vsel %vm47_vm1, 1.0, %v621_v16 }
  0x85   :  { %106 = vmatmul.f32.vlgmr.msra.gmra.mxu0 %v105_v31  ;;  %v110_v42 = vsub.f32 %v508_v38, %v508_v38 }
  0x87   :  { %278 = vmatmul.f32.gmra.mxu2 %v110_v42  ;;  %v111_v46 = vand.u32 4294901760, %v110_v42 }
  0x89   :  { %323 = vmatmul.f32.gmra.mxu3 %v111_v46  ;;  %v112_v47 = vsub.f32 %v110_v42, %v111_v46 }
  0x8b   :  { %v113_v48 = vand.u32 4294901760, %v112_v47 }
  0x8c   :  { %513 = vmatmul.msk.f32.vlgmr.msrb.gmra.mxu1 %vm46_vm0, %v620_v15 }
  0x8d   :  { %114 = vmatmul.f32.gmra.mxu0 %v113_v48 }
  0x8f   :  { %512 = vmatmul.msk.f32.vlgmr.msrb.gmra.mxu2 %vm47_vm1, %v620_v15 }
  0x91   :  { %514 = vmatmul.msk.f32.vlgmr.msrb.gmra.mxu3 %vm47_vm1, %v620_v15 }
  0x95   :  { %511 = vmatmul.msk.f32.vlgmr.msrb.gmra.mxu0 %vm46_vm0, %v620_v15 }
  0xa4   :  { %v467_v12 = vpop.permute.xlu2 %466 }
  0xa5   :  { %vm471_vm2 = vcmp.eq.s32.totalorder %v467_v12, %v860_v8 }
  0xac   :  { %v470_v37 = vpop.permute.xlu2 %469 }
  0xad   :  { %vm472_vm3 = vcmp.eq.s32.totalorder %v470_v37, %v860_v8 }
  0xf9   :  { %v216_v49 = vpop.f32.mrf.mxu1 }
 0x101   :  { %v220_v59 = vpop.f32.mrf.mxu1 }
 0x102   :  { %v107_v55 = vpop.f32.mrf.mxu0  ;;  %v274_v56 = vpop.f32.mrf.mxu2 }
 0x103   :  { %v108_v58 = vadd.f32 %v107_v55, %v68_v54 }
 0x104   :  { %v318_v57 = vpop.f32.mrf.mxu3 }
 0x105   :  { %v217_v60 = vadd.f32 %v216_v49, %v108_v58 }
 0x107   :  { %v275_v1 = vadd.f32 %v274_v56, %v217_v60 }
 0x109   :  { %v319_v5 = vadd.f32 %v318_v57, %v275_v1  ;;  %v434_v18 = vpop.f32.mrf.mxu1 }
 0x10a   :  { %v115_v61 = vpop.f32.mrf.mxu0  ;;  %v279_v62 = vpop.f32.mrf.mxu2 }
 0x10b   :  { %v116_v63 = vadd.f32 %v115_v61, %v68_v54 }
 0x10c   :  { %v324_v0 = vpop.f32.mrf.mxu3 }
 0x10d   :  { %v221_v2 = vadd.f32 %v220_v59, %v116_v63 }
 0x10f   :  { %v280_v4 = vadd.f32 %v279_v62, %v221_v2 }
 0x111   :  { %v325_v6 = vadd.f32 %v324_v0, %v280_v4 }
 0x112   :  { %v393_v10 = vpop.f32.mrf.mxu0  ;;  %v397_v11 = vpop.f32.mrf.mxu2 }
 0x113   :  { %v394_v13 = vadd.f32 %v393_v10, %v319_v5  ;;  %v398_v17 = vadd.f32 %v397_v11, %v325_v6 }
 0x114   :  { %v438_v19 = vpop.f32.mrf.mxu3 }
 0x115   :  { %v435_v20 = vadd.f32 %v434_v18, %v394_v13  ;;  %v439_v23 = vadd.f32 %v438_v19, %v398_v17 }
 0x117   :  { %441 = vst [vmem:[#allocation5] sm:$0xff] %v435_v20  ;;  %445 = vmax.xlane.f32.xlu1 %v435_v20  ;;  %v473_v24 = vsel %vm471_vm2, %v435_v20, 0.0  ;;  %v474_v39 = vsel %vm472_vm3, %v439_v23, 0.0 }
 0x118   :  { %442 = vst [vmem:[#allocation5 + $0x8] sm:$0xff] %v439_v23  ;;  %475 = vadd.xlane.f32.xlu2 %v473_v24 }
 0x119   :  { %496 = dma.vmem_to_hbm [thread:$0]  %s489_s7, 256, %s491_s10, [#allocation4], %s617_s23, %s617_s23, %s618_s24  }
 0x11f   :  { %447 = vmax.xlane.f32.xlu1 %v439_v23 }
 0x18a   :  { %v446_v25 = vpop.xlane.xlu1 %445 }
 0x18b   :  { %v449_v29 = vsub.f32 %v435_v20, %v446_v25  ;;  %v476_v50 = vpop.xlane.xlu2 %475 }
 0x18d   :  { %v451_v30 = vmul.f32 1.442695, %v449_v29 }
 0x18f   :  { %556 = vpow2.f32 %v451_v30 }
 0x192   :  { %v448_v32 = vpop.xlane.xlu1 %447 }
 0x193   :  { %v450_v33 = vsub.f32 %v439_v23, %v448_v32 }
 0x195   :  { %v557_v34 = vpop.eup %556  ;;  %v453_v35 = vmul.f32 1.442695, %v450_v33 }
 0x196   :  { %455 = vadd.xlane.f32.xlu0 %v557_v34 }
 0x197   :  { %558 = vpow2.f32 %v453_v35 }
 0x19d   :  { %v559_v36 = vpop.eup %558 }
 0x19e   :  { %457 = vadd.xlane.f32.xlu1 %v559_v36 }
 0x1a6   :  { %477 = vadd.xlane.f32.xlu1 %v474_v39 }
 0x209   :  { %v456_v40 = vpop.xlane.xlu0 %455 }
 0x20a   :  { %560 = vlog2.f32 %v456_v40 }
 0x210   :  { %v561_v41 = vpop.eup %560 }
 0x211   :  { %v460_v43 = vmul.f32 0.6931472, %v561_v41  ;;  %v458_v44 = vpop.xlane.xlu1 %457 }
 0x212   :  { %562 = vlog2.f32 %v458_v44 }
 0x213   :  { %v463_v45 = vadd.f32 %v460_v43, %v446_v25 }
 0x215   :  { %v479_v51 = vsub.f32 %v463_v45, %v476_v50 }
 0x217   :  { %482 = vst.msk [vmem:[%s897_s5] sm:$0xff] %vm481_vm4, %v479_v51 }
 0x218   :  { %v563_v52 = vpop.eup %562 }
 0x219   :  { %v462_v53 = vmul.f32 0.6931472, %v563_v52  ;;  %v478_v7 = vpop.xlane.xlu1 %477 }
 0x21b   :  { %v464_v3 = vadd.f32 %v462_v53, %v448_v32 }
 0x21d   :  { %v480_v8 = vsub.f32 %v464_v3, %v478_v7 }
 0x21f   :  { %483 = vst.msk [vmem:[%s897_s5 + $0x8] sm:$0xff] %vm481_vm4, %v480_v8 }
 0x220   :  { %614 = dma.done.wait [#allocation4], 256  }
 0x221   :  { %615 = vsyncadd [#allocation4], 4294967040 }
 0x222   :  { %505 = vsyncpa [#allocation3], 1 }
 0x223   :  { %506 = vsyncpa [#allocation4], 1 }

</bundles_post_ra>
